<compile_context>
chip_gen: v5e
topology: v5e:2x2
jax: 0.10.0
libtpu: 0.0.40
codegen_flags: <defaults>
</compile_context>

<pallas_src>
import functools

import jax
import jax.numpy as jnp
from jax.experimental import pallas as pl
from jax.experimental.pallas import tpu as pltpu


def _default_exp_dtype():
    """bf16 exp (bf16 EUP/VPU) on v6e/v7x; f32 elsewhere (v5e has no bf16 VPU/EUP)."""
    try:
        kind = jax.devices()[0].device_kind.lower()
    except Exception:
        return jnp.float32
    return jnp.bfloat16 if ("v6" in kind or "v7" in kind) else jnp.float32


def _mha_kernel(*refs, n_head, d_k, d_v, eps, has_mask, return_attn,
                mxu_dtype, exp_dtype):
    # ---- unpack refs: inputs, outputs, scratch ------------------------------
    q_ref, k_ref, v_ref = refs[0], refs[1], refs[2]
    idx = 3
    bias_ref = None
    if has_mask:
        bias_ref = refs[idx]
        idx += 1
    wq_ref, wk_ref, wv_ref, wfc_ref, gamma_ref, beta_ref = refs[idx:idx + 6]
    idx += 6
    out_ref = refs[idx]
    idx += 1
    attn_ref = None
    if return_attn:
        attn_ref = refs[idx]
        idx += 1
    qh_s, kh_s, vh_s, m_s, l_s, acc_s = refs[idx:]

    H, dk, dv = n_head, d_k, d_v
    qi = pl.program_id(1)
    ki = pl.program_id(2)
    nk = pl.num_programs(2)
    tq = q_ref.shape[1]
    tk = k_ref.shape[1]

    # ---- K/V projection + head relayout, hoisted: once per batch (qi == 0) --
    @pl.when(qi == 0)
    def _project_kv():
        kp = jnp.dot(k_ref[0], wk_ref[...],
                     preferred_element_type=jnp.float32)          # (tk, H*dk)
        vp = jnp.dot(v_ref[0], wv_ref[...],
                     preferred_element_type=jnp.float32)          # (tk, H*dv)
        kh_s[ki] = jnp.transpose(kp.reshape(tk, H, dk), (1, 0, 2)).astype(mxu_dtype)
        vh_s[ki] = jnp.transpose(vp.reshape(tk, H, dv), (1, 0, 2)).astype(mxu_dtype)

    # ---- Q projection + softmax-state init: once per q tile (ki == 0) -------
    @pl.when(ki == 0)
    def _project_q():
        qp = jnp.dot(q_ref[0].astype(mxu_dtype), wq_ref[...],
                     preferred_element_type=jnp.float32)          # (tq, H*dk)
        qp = qp * (1.0 / (d_k ** 0.5))
        qh_s[...] = jnp.transpose(qp.reshape(tq, H, dk), (1, 0, 2)).astype(mxu_dtype)
        m_s[...] = jnp.full(m_s.shape, -jnp.inf, dtype=m_s.dtype)
        l_s[...] = jnp.zeros(l_s.shape, dtype=l_s.dtype)
        acc_s[...] = jnp.zeros(acc_s.shape, dtype=acc_s.dtype)

    # ---- scores for this (q-tile, k-tile): MXU, f32 accumulation ------------
    kh = kh_s[ki]                                                 # (H, tk, dk) bf16
    vh = vh_s[ki]                                                 # (H, tk, dv) bf16
    scores = jnp.einsum("hqd,hkd->hqk", qh_s[...], kh,
                        preferred_element_type=jnp.float32)       # (H, tq, tk) f32
    if has_mask:
        # additive bias (0 keep / -1e9 masked), single add for all heads
        scores = scores + bias_ref[0].astype(jnp.float32)[None, :, :]

    # ---- online (flash-style) softmax update --------------------------------
    m_prev = m_s[...]
    m_new = jnp.maximum(m_prev, jnp.max(scores, axis=-1, keepdims=True))
    alpha = jnp.exp(m_prev - m_new)                               # (H, tq, 1) f32
    s_shift = scores - m_new
    if jnp.dtype(exp_dtype) == jnp.dtype(jnp.float32):
        p = jnp.exp(s_shift)                                      # f32 exp (v5e)
        p_mx = p.astype(mxu_dtype)
    else:
        p_mx = jnp.exp(s_shift.astype(exp_dtype))                 # bf16 exp on EUP
        p = p_mx.astype(jnp.float32)
    l_new = alpha * l_s[...] + jnp.sum(p, axis=-1, keepdims=True)
    acc_s[...] = alpha * acc_s[...] + jnp.einsum(
        "hqk,hkd->hqd", p_mx, vh, preferred_element_type=jnp.float32)
    m_s[...] = m_new
    l_s[...] = l_new

    if return_attn:
        # return_attn forces nk == 1 in the wrapper, so l_new is the full row
        # sum already; exact reciprocal so emitted rows sum to ~1.
        attn_ref[0] = (p * (1.0 / l_new)).astype(attn_ref.dtype)

    # ---- finalize: normalize, output proj, residual, LayerNorm --------------
    @pl.when(ki == nk - 1)
    def _finalize():
        ctx = acc_s[...] * pl.reciprocal(l_s[...], approx=True)   # (H, tq, dv)
        concat = jnp.transpose(ctx, (1, 0, 2)).reshape(tq, H * dv)
        proj = jnp.dot(concat.astype(mxu_dtype), wfc_ref[...],
                       preferred_element_type=jnp.float32)        # (tq, D)
        x = proj + q_ref[0].astype(jnp.float32)                   # residual
        mean = jnp.mean(x, axis=-1, keepdims=True)
        var = jnp.mean((x - mean) ** 2, axis=-1, keepdims=True)
        y = (x - mean) * jax.lax.rsqrt(var + eps)
        y = y * gamma_ref[...] + beta_ref[...]
        out_ref[0] = y.astype(out_ref.dtype)


def multi_head_attention(q, k, v, params, *, n_head, d_k, d_v, mask=None,
                         eps=1e-6, q_tile=128, k_tile=512,
                         mxu_dtype=jnp.bfloat16, attn_dtype=jnp.bfloat16,
                         return_attn=False, exp_dtype=None):
    """q, k, v: [B, L, d_model] float32.

    Returns (out [B, Lq, D] f32, attn [B, H, Lq, Lk] or None).
    """
    B, Lq, D = q.shape
    Lk = k.shape[1]
    Lv = v.shape[1]
    assert Lk == Lv, "key/value lengths must match"

    wq, wk, wv, wfc, gamma, beta = params  # wq/wk/wv: (D, H*dk), wfc: (H*dv, D)
    wq = wq.astype(mxu_dtype)
    wk = wk.astype(mxu_dtype)
    wv = wv.astype(mxu_dtype)
    wfc = wfc.astype(mxu_dtype)
    gamma2 = gamma.reshape(1, D).astype(jnp.float32)
    beta2 = beta.reshape(1, D).astype(jnp.float32)

    # K/V are only ever consumed in MXU dtype inside the kernel: cast here to
    # halve their HBM DMA and double-buffered VMEM footprint.  Q stays f32
    # (needed for the residual / LayerNorm).
    k = k.astype(mxu_dtype)
    v = v.astype(mxu_dtype)

    if exp_dtype is None:
        exp_dtype = _default_exp_dtype()

    has_mask = mask is not None

    # ---- tiling --------------------------------------------------------------
    tq = min(q_tile, Lq)
    if tq < Lq and tq % 8 != 0:
        tq = max(8, (tq // 8) * 8)
    nq = pl.cdiv(Lq, tq)          # partial last q tile is safe: rows are independent
    if return_attn:
        tk = Lk                   # single K tile -> exact softmax for emitted probs
    else:
        tk = min(k_tile, Lk)
        if Lk % tk != 0:
            tk = Lk               # avoid garbage-padded K columns in the softmax
    if has_mask and tk != Lk and tk % 128 != 0:
        tk = Lk                   # bias block lane dim must be 128-aligned or full
    nk = Lk // tk

    kernel = functools.partial(
        _mha_kernel, n_head=n_head, d_k=d_k, d_v=d_v, eps=eps,
        has_mask=has_mask, return_attn=return_attn,
        mxu_dtype=mxu_dtype, exp_dtype=exp_dtype)

    inputs = [q, k, v]
    in_specs = [
        pl.BlockSpec((1, tq, D), lambda b, qi, ki: (b, qi, 0)),
        pl.BlockSpec((1, tk, D), lambda b, qi, ki: (b, ki, 0)),
        pl.BlockSpec((1, tk, D), lambda b, qi, ki: (b, ki, 0)),
    ]
    if has_mask:
        mask_b = jnp.broadcast_to(
            jnp.asarray(mask, jnp.float32).reshape(B, -1, Lk), (B, Lq, Lk))
        bias = ((mask_b - 1.0) * 1e9).astype(jnp.bfloat16)   # 0 keep / -1e9 masked
        inputs.append(bias)
        in_specs.append(pl.BlockSpec((1, tq, tk), lambda b, qi, ki: (b, qi, ki)))
    inputs += [wq, wk, wv, wfc, gamma2, beta2]
    in_specs += [
        pl.BlockSpec((D, n_head * d_k), lambda b, qi, ki: (0, 0)),
        pl.BlockSpec((D, n_head * d_k), lambda b, qi, ki: (0, 0)),
        pl.BlockSpec((D, n_head * d_v), lambda b, qi, ki: (0, 0)),
        pl.BlockSpec((n_head * d_v, D), lambda b, qi, ki: (0, 0)),
        pl.BlockSpec((1, D), lambda b, qi, ki: (0, 0)),
        pl.BlockSpec((1, D), lambda b, qi, ki: (0, 0)),
    ]

    out_specs = [pl.BlockSpec((1, tq, D), lambda b, qi, ki: (b, qi, 0))]
    out_shape = [jax.ShapeDtypeStruct((B, Lq, D), q.dtype)]
    if return_attn:
        out_specs.append(pl.BlockSpec((1, n_head, tq, Lk),
                                      lambda b, qi, ki: (b, 0, qi, 0)))
        out_shape.append(jax.ShapeDtypeStruct((B, n_head, Lq, Lk), attn_dtype))

    scratch_shapes = [
        pltpu.VMEM((n_head, tq, d_k), mxu_dtype),       # qh  (per q tile)
        pltpu.VMEM((nk, n_head, tk, d_k), mxu_dtype),   # kh  (full Lk, per batch)
        pltpu.VMEM((nk, n_head, tk, d_v), mxu_dtype),   # vh
        pltpu.VMEM((n_head, tq, 1), jnp.float32),       # m   (running max)
        pltpu.VMEM((n_head, tq, 1), jnp.float32),       # l   (running denominator)
        pltpu.VMEM((n_head, tq, d_v), jnp.float32),     # acc (unnormalized context)
    ]

    # ---- generation-aware VMEM budget (lane-padded accounting) ---------------
    def _padded_bytes(shape, dtype):
        dims = list(shape)
        if len(dims) >= 1:
            dims[-1] = -(-dims[-1] // 128) * 128
        if len(dims) >= 2:
            dims[-2] = -(-dims[-2] // 8) * 8
        n = 1
        for s in dims:
            n *= s
        return n * jnp.dtype(dtype).itemsize

    tile_bytes = 2 * (_padded_bytes((1, tq, D), q.dtype)
                      + _padded_bytes((1, tk, D), k.dtype)
                      + _padded_bytes((1, tk, D), v.dtype)
                      + _padded_bytes((1, tq, D), q.dtype))
    if has_mask:
        tile_bytes += 2 * _padded_bytes((1, tq, tk), jnp.bfloat16)
    if return_attn:
        tile_bytes += 2 * _padded_bytes((1, n_head, tq, Lk), attn_dtype)
    weight_bytes = 2 * sum(_padded_bytes(w.shape, w.dtype)
                           for w in (wq, wk, wv, wfc, gamma2, beta2))
    scratch_bytes = sum(_padded_bytes(s.shape, s.dtype) for s in scratch_shapes)
    interm_bytes = 4 * _padded_bytes((n_head, tq, tk), jnp.float32)
    vmem_needed = tile_bytes + weight_bytes + scratch_bytes + interm_bytes + (8 << 20)
    try:
        cap = int(getattr(pltpu.get_tpu_info(), "vmem_capacity_bytes", 64 << 20))
    except Exception:
        cap = 64 << 20                       # conservative: v7x physical VMEM
    vmem_limit = int(min(max(vmem_needed, 16 << 20), int(cap * 0.9)))

    results = pl.pallas_call(
        kernel,
        grid_spec=pltpu.PrefetchScalarGridSpec(
            num_scalar_prefetch=0,
            grid=(B, nq, nk),
            in_specs=in_specs,
            out_specs=out_specs,
            scratch_shapes=scratch_shapes),
        out_shape=out_shape,
        compiler_params=pltpu.CompilerParams(
            dimension_semantics=("parallel", "arbitrary", "arbitrary"),
            vmem_limit_bytes=vmem_limit),
    )(*inputs)

    if return_attn:
        out, attn = results
        return out, attn
    (out,) = results
    return out, None


def _reference(q, k, v, params, *, n_head, d_k, d_v, mask=None, eps=1e-6):
    """Pure-JAX reference mirroring the PyTorch forward (dropout = identity)."""
    wq, wk, wv, wfc, gamma, beta = params
    B, Lq, D = q.shape
    Lk = k.shape[1]
    residual = q
    qp = (q @ wq).reshape(B, Lq, n_head, d_k).transpose(0, 2, 1, 3)
    kp = (k @ wk).reshape(B, Lk, n_head, d_k).transpose(0, 2, 1, 3)
    vp = (v @ wv).reshape(B, Lk, n_head, d_v).transpose(0, 2, 1, 3)
    scores = jnp.einsum("bhqd,bhkd->bhqk", qp / (d_k ** 0.5), kp)
    if mask is not None:
        m = jnp.broadcast_to(jnp.asarray(mask, jnp.float32).reshape(B, -1, Lk),
                             (B, Lq, Lk))
        scores = jnp.where(m[:, None] == 0.0, -1e9, scores)
    attn = jax.nn.softmax(scores, axis=-1)
    o = jnp.einsum("bhqk,bhkd->bhqd", attn, vp)
    o = o.transpose(0, 2, 1, 3).reshape(B, Lq, n_head * d_v)
    o = o @ wfc + residual
    mean = jnp.mean(o, axis=-1, keepdims=True)
    var = jnp.mean((o - mean) ** 2, axis=-1, keepdims=True)
    o = (o - mean) / jnp.sqrt(var + eps) * gamma + beta
    return o, attn


if __name__ == "__main__":
    B, L, d_model = 2, 8, 32
    n_head, d_k, d_v = 2, 8, 8

    keys = jax.random.split(jax.random.PRNGKey(0), 10)

    q = jax.random.normal(keys[0], (B, L, d_model), dtype=jnp.float32)
    k = jax.random.normal(keys[1], (B, L, d_model), dtype=jnp.float32)
    v = jax.random.normal(keys[2], (B, L, d_model), dtype=jnp.float32)

    scale = 0.1
    wq = scale * jax.random.normal(keys[3], (d_model, n_head * d_k), dtype=jnp.float32)
    wk = scale * jax.random.normal(keys[4], (d_model, n_head * d_k), dtype=jnp.float32)
    wv = scale * jax.random.normal(keys[5], (d_model, n_head * d_v), dtype=jnp.float32)
    wfc = scale * jax.random.normal(keys[6], (n_head * d_v, d_model), dtype=jnp.float32)
    gamma = jnp.ones((d_model,), dtype=jnp.float32)   # LayerNorm weight
    beta = jnp.zeros((d_model,), dtype=jnp.float32)   # LayerNorm bias
    params = (wq, wk, wv, wfc, gamma, beta)

    # 1) default fast path: no mask, no attention-probability writeback
    out, attn = multi_head_attention(q, k, v, params,
                                     n_head=n_head, d_k=d_k, d_v=d_v)
    jax.block_until_ready(out)
    ref_out, ref_attn = _reference(q, k, v, params, n_head=n_head, d_k=d_k, d_v=d_v)
    assert attn is None
    assert jnp.allclose(out, ref_out, atol=2e-2, rtol=2e-2), "output mismatch (no mask)"

    # 2) masked path returning attention probabilities (bf16 writeback)
    causal = jnp.broadcast_to(jnp.tril(jnp.ones((L, L), dtype=jnp.float32)), (B, L, L))
    out_m, attn_m = multi_head_attention(q, k, v, params, n_head=n_head, d_k=d_k,
                                         d_v=d_v, mask=causal, return_attn=True)
    jax.block_until_ready((out_m, attn_m))
    ref_out_m, ref_attn_m = _reference(q, k, v, params, n_head=n_head, d_k=d_k,
                                       d_v=d_v, mask=causal)
    assert jnp.allclose(out_m, ref_out_m, atol=2e-2, rtol=2e-2), "output mismatch (mask)"
    assert jnp.allclose(attn_m.astype(jnp.float32), ref_attn_m,
                        atol=2e-2, rtol=2e-2), "attn mismatch (mask)"

    # 3) multi-tile path: exercises online softmax + K/V projection hoist
    L2 = 16
    q2 = jax.random.normal(keys[7], (B, L2, d_model), dtype=jnp.float32)
    k2 = jax.random.normal(keys[8], (B, L2, d_model), dtype=jnp.float32)
    v2 = jax.random.normal(keys[9], (B, L2, d_model), dtype=jnp.float32)
    out2, _ = multi_head_attention(q2, k2, v2, params, n_head=n_head, d_k=d_k,
                                   d_v=d_v, q_tile=8, k_tile=8)
    jax.block_until_ready(out2)
    ref_out2, _ = _reference(q2, k2, v2, params, n_head=n_head, d_k=d_k, d_v=d_v)
    assert jnp.allclose(out2, ref_out2, atol=2e-2, rtol=2e-2), "output mismatch (tiled)"

    # TODO(synk): nn.Dropout (attention + output) is identity (eval mode);
    # training-mode stochastic dropout is not implemented.
    print("KERNEL_OK")
</pallas_src>

<mosaic_0001>
module attributes {stable_mosaic.version = 11 : i64} {
  func.func @_mha_kernel(%arg0: i32, %arg1: i32, %arg2: i32, %arg3: memref<1x8x32xf32, #tpu.memory_space<vmem>>, %arg4: memref<1x8x32xbf16, #tpu.memory_space<vmem>>, %arg5: memref<1x8x32xbf16, #tpu.memory_space<vmem>>, %arg6: memref<32x16xbf16, #tpu.memory_space<vmem>>, %arg7: memref<32x16xbf16, #tpu.memory_space<vmem>>, %arg8: memref<32x16xbf16, #tpu.memory_space<vmem>>, %arg9: memref<16x32xbf16, #tpu.memory_space<vmem>>, %arg10: memref<1x32xf32, #tpu.memory_space<vmem>>, %arg11: memref<1x32xf32, #tpu.memory_space<vmem>>, %arg12: memref<1x8x32xf32, #tpu.memory_space<vmem>>, %arg13: memref<2x8x8xbf16, #tpu.memory_space<vmem>>, %arg14: memref<1x2x8x8xbf16, #tpu.memory_space<vmem>>, %arg15: memref<1x2x8x8xbf16, #tpu.memory_space<vmem>>, %arg16: memref<2x8x1xf32, #tpu.memory_space<vmem>>, %arg17: memref<2x8x1xf32, #tpu.memory_space<vmem>>, %arg18: memref<2x8x8xf32, #tpu.memory_space<vmem>>) attributes {dimension_semantics = [#tpu.dimension_semantics<parallel>, #tpu.dimension_semantics<arbitrary>, #tpu.dimension_semantics<arbitrary>], iteration_bounds = array<i64: 2, 1, 1>, scalar_prefetch = 0 : i64, scratch_operands = 6 : i64, tpu.core_type = #tpu.core_type<tc>, window_params = [{transform_indices = @transform_0, window_bounds = array<i64: 1, 8, 32>}, {transform_indices = @transform_1, window_bounds = array<i64: 1, 8, 32>}, {transform_indices = @transform_2, window_bounds = array<i64: 1, 8, 32>}, {pipeline_mode = #tpu.pipeline_mode<synchronous>, transform_indices = @transform_3, window_bounds = array<i64: 32, 16>}, {pipeline_mode = #tpu.pipeline_mode<synchronous>, transform_indices = @transform_4, window_bounds = array<i64: 32, 16>}, {pipeline_mode = #tpu.pipeline_mode<synchronous>, transform_indices = @transform_5, window_bounds = array<i64: 32, 16>}, {pipeline_mode = #tpu.pipeline_mode<synchronous>, transform_indices = @transform_6, window_bounds = array<i64: 16, 32>}, {pipeline_mode = #tpu.pipeline_mode<synchronous>, transform_indices = @transform_7, window_bounds = array<i64: 1, 32>}, {pipeline_mode = #tpu.pipeline_mode<synchronous>, transform_indices = @transform_8, window_bounds = array<i64: 1, 32>}, {transform_indices = @transform_9, window_bounds = array<i64: 1, 8, 32>}]} {
    %c0_i32 = arith.constant 0 : i32
    %0 = arith.cmpi eq, %arg1, %c0_i32 : i32
    %1 = arith.extui %0 : i1 to i32
    %c0_i32_0 = arith.constant 0 : i32
    %2 = arith.cmpi ne, %1, %c0_i32_0 : i32
    scf.if %2 {
      %c0_34 = arith.constant 0 : index
      %c0_35 = arith.constant 0 : index
      %c0_36 = arith.constant 0 : index
      %40 = vector.load %arg4[%c0_34, %c0_35, %c0_36] : memref<1x8x32xbf16, #tpu.memory_space<vmem>>, vector<1x8x32xbf16>
      %41 = vector.shape_cast %40 : vector<1x8x32xbf16> to vector<8x32xbf16>
      %c0_37 = arith.constant 0 : index
      %c0_38 = arith.constant 0 : index
      %42 = vector.load %arg7[%c0_37, %c0_38] : memref<32x16xbf16, #tpu.memory_space<vmem>>, vector<32x16xbf16>
      %cst_39 = arith.constant dense<0.000000e+00> : vector<8x16xf32>
      %43 = tpu.matmul %41, %42, %cst_39 {dimension_numbers = #tpu.dot_dimension_numbers<[1], [0], [0], [1], [0, 0, 1, 1], [], []>} : vector<8x32xbf16>, vector<32x16xbf16>, vector<8x16xf32> -> vector<8x16xf32>
      %c0_40 = arith.constant 0 : index
      %c0_41 = arith.constant 0 : index
      %c0_42 = arith.constant 0 : index
      %44 = vector.load %arg5[%c0_40, %c0_41, %c0_42] : memref<1x8x32xbf16, #tpu.memory_space<vmem>>, vector<1x8x32xbf16>
      %45 = vector.shape_cast %44 : vector<1x8x32xbf16> to vector<8x32xbf16>
      %c0_43 = arith.constant 0 : index
      %c0_44 = arith.constant 0 : index
      %46 = vector.load %arg8[%c0_43, %c0_44] : memref<32x16xbf16, #tpu.memory_space<vmem>>, vector<32x16xbf16>
      %cst_45 = arith.constant dense<0.000000e+00> : vector<8x16xf32>
      %47 = tpu.matmul %45, %46, %cst_45 {dimension_numbers = #tpu.dot_dimension_numbers<[1], [0], [0], [1], [0, 0, 1, 1], [], []>} : vector<8x32xbf16>, vector<32x16xbf16>, vector<8x16xf32> -> vector<8x16xf32>
      %48 = vector.shape_cast %43 : vector<8x16xf32> to vector<8x2x8xf32>
      %49 = tpu.transpose %48, [1, 0, 2] : vector<8x2x8xf32> -> vector<2x8x8xf32>
      %50 = arith.truncf %49 : vector<2x8x8xf32> to vector<2x8x8xbf16>
      %51 = arith.index_cast %arg2 : i32 to index
      %c0_46 = arith.constant 0 : index
      %c0_47 = arith.constant 0 : index
      %c0_48 = arith.constant 0 : index
      %52 = vector.load %arg14[%51, %c0_46, %c0_47, %c0_48] : memref<1x2x8x8xbf16, #tpu.memory_space<vmem>>, vector<1x2x8x8xbf16>
      %53 = vector.shape_cast %52 : vector<1x2x8x8xbf16> to vector<2x8x8xbf16>
      %54 = vector.shape_cast %50 : vector<2x8x8xbf16> to vector<1x2x8x8xbf16>
      tpu.vector_store %arg14[%51, %c0_46, %c0_47, %c0_48], %54 {strides = array<i32>} : memref<1x2x8x8xbf16, #tpu.memory_space<vmem>>, vector<1x2x8x8xbf16>,
      %55 = vector.shape_cast %47 : vector<8x16xf32> to vector<8x2x8xf32>
      %56 = tpu.transpose %55, [1, 0, 2] : vector<8x2x8xf32> -> vector<2x8x8xf32>
      %57 = arith.truncf %56 : vector<2x8x8xf32> to vector<2x8x8xbf16>
      %58 = arith.index_cast %arg2 : i32 to index
      %c0_49 = arith.constant 0 : index
      %c0_50 = arith.constant 0 : index
      %c0_51 = arith.constant 0 : index
      %59 = vector.load %arg15[%58, %c0_49, %c0_50, %c0_51] : memref<1x2x8x8xbf16, #tpu.memory_space<vmem>>, vector<1x2x8x8xbf16>
      %60 = vector.shape_cast %59 : vector<1x2x8x8xbf16> to vector<2x8x8xbf16>
      %61 = vector.shape_cast %57 : vector<2x8x8xbf16> to vector<1x2x8x8xbf16>
      tpu.vector_store %arg15[%58, %c0_49, %c0_50, %c0_51], %61 {strides = array<i32>} : memref<1x2x8x8xbf16, #tpu.memory_space<vmem>>, vector<1x2x8x8xbf16>,
    } else {
    }
    %c0_i32_1 = arith.constant 0 : i32
    %3 = arith.cmpi eq, %arg2, %c0_i32_1 : i32
    %4 = arith.extui %3 : i1 to i32
    %c0_i32_2 = arith.constant 0 : i32
    %5 = arith.cmpi ne, %4, %c0_i32_2 : i32
    scf.if %5 {
      %c0_34 = arith.constant 0 : index
      %c0_35 = arith.constant 0 : index
      %c0_36 = arith.constant 0 : index
      %40 = vector.load %arg3[%c0_34, %c0_35, %c0_36] : memref<1x8x32xf32, #tpu.memory_space<vmem>>, vector<1x8x32xf32>
      %41 = vector.shape_cast %40 : vector<1x8x32xf32> to vector<8x32xf32>
      %42 = arith.truncf %41 : vector<8x32xf32> to vector<8x32xbf16>
      %c0_37 = arith.constant 0 : index
      %c0_38 = arith.constant 0 : index
      %43 = vector.load %arg6[%c0_37, %c0_38] : memref<32x16xbf16, #tpu.memory_space<vmem>>, vector<32x16xbf16>
      %cst_39 = arith.constant dense<0.000000e+00> : vector<8x16xf32>
      %44 = tpu.matmul %42, %43, %cst_39 {dimension_numbers = #tpu.dot_dimension_numbers<[1], [0], [0], [1], [0, 0, 1, 1], [], []>} : vector<8x32xbf16>, vector<32x16xbf16>, vector<8x16xf32> -> vector<8x16xf32>
      %cst_40 = arith.constant 0.353553385 : f32
      %45 = vector.broadcast %cst_40 : f32 to vector<8x16xf32>
      %46 = arith.mulf %44, %45 : vector<8x16xf32>
      %47 = vector.shape_cast %46 : vector<8x16xf32> to vector<8x2x8xf32>
      %48 = tpu.transpose %47, [1, 0, 2] : vector<8x2x8xf32> -> vector<2x8x8xf32>
      %49 = arith.truncf %48 : vector<2x8x8xf32> to vector<2x8x8xbf16>
      %c0_41 = arith.constant 0 : index
      %c0_42 = arith.constant 0 : index
      %c0_43 = arith.constant 0 : index
      %50 = vector.load %arg13[%c0_41, %c0_42, %c0_43] : memref<2x8x8xbf16, #tpu.memory_space<vmem>>, vector<2x8x8xbf16>
      tpu.vector_store %arg13[%c0_41, %c0_42, %c0_43], %49 {strides = array<i32>} : memref<2x8x8xbf16, #tpu.memory_space<vmem>>, vector<2x8x8xbf16>,
      %cst_44 = arith.constant 0xFF800000 : f32
      %51 = vector.broadcast %cst_44 : f32 to vector<2x8x1xf32>
      %c0_45 = arith.constant 0 : index
      %c0_46 = arith.constant 0 : index
      %c0_47 = arith.constant 0 : index
      %52 = vector.load %arg16[%c0_45, %c0_46, %c0_47] : memref<2x8x1xf32, #tpu.memory_space<vmem>>, vector<2x8x1xf32>
      tpu.vector_store %arg16[%c0_45, %c0_46, %c0_47], %51 {strides = array<i32>} : memref<2x8x1xf32, #tpu.memory_space<vmem>>, vector<2x8x1xf32>,
      %cst_48 = arith.constant 0.000000e+00 : f32
      %53 = vector.broadcast %cst_48 : f32 to vector<2x8x1xf32>
      %c0_49 = arith.constant 0 : index
      %c0_50 = arith.constant 0 : index
      %c0_51 = arith.constant 0 : index
      %54 = vector.load %arg17[%c0_49, %c0_50, %c0_51] : memref<2x8x1xf32, #tpu.memory_space<vmem>>, vector<2x8x1xf32>
      tpu.vector_store %arg17[%c0_49, %c0_50, %c0_51], %53 {strides = array<i32>} : memref<2x8x1xf32, #tpu.memory_space<vmem>>, vector<2x8x1xf32>,
      %cst_52 = arith.constant 0.000000e+00 : f32
      %55 = vector.broadcast %cst_52 : f32 to vector<2x8x8xf32>
      %c0_53 = arith.constant 0 : index
      %c0_54 = arith.constant 0 : index
      %c0_55 = arith.constant 0 : index
      %56 = vector.load %arg18[%c0_53, %c0_54, %c0_55] : memref<2x8x8xf32, #tpu.memory_space<vmem>>, vector<2x8x8xf32>
      tpu.vector_store %arg18[%c0_53, %c0_54, %c0_55], %55 {strides = array<i32>} : memref<2x8x8xf32, #tpu.memory_space<vmem>>, vector<2x8x8xf32>,
    } else {
    }
    %6 = arith.index_cast %arg2 : i32 to index
    %c0 = arith.constant 0 : index
    %c0_3 = arith.constant 0 : index
    %c0_4 = arith.constant 0 : index
    %7 = vector.load %arg14[%6, %c0, %c0_3, %c0_4] : memref<1x2x8x8xbf16, #tpu.memory_space<vmem>>, vector<1x2x8x8xbf16>
    %8 = vector.shape_cast %7 : vector<1x2x8x8xbf16> to vector<2x8x8xbf16>
    %9 = arith.index_cast %arg2 : i32 to index
    %c0_5 = arith.constant 0 : index
    %c0_6 = arith.constant 0 : index
    %c0_7 = arith.constant 0 : index
    %10 = vector.load %arg15[%9, %c0_5, %c0_6, %c0_7] : memref<1x2x8x8xbf16, #tpu.memory_space<vmem>>, vector<1x2x8x8xbf16>
    %11 = vector.shape_cast %10 : vector<1x2x8x8xbf16> to vector<2x8x8xbf16>
    %c0_8 = arith.constant 0 : index
    %c0_9 = arith.constant 0 : index
    %c0_10 = arith.constant 0 : index
    %12 = vector.load %arg13[%c0_8, %c0_9, %c0_10] : memref<2x8x8xbf16, #tpu.memory_space<vmem>>, vector<2x8x8xbf16>
    "tpu.trace_start"() <{level = 10 : i32, message = "hqd,hkd->hqk"}> : () -> ()
    %cst = arith.constant dense<0.000000e+00> : vector<2x8x8xf32>
    %13 = tpu.matmul %12, %8, %cst {dimension_numbers = #tpu.dot_dimension_numbers<[2], [2], [1], [1], [0, 0, 0, 1, 1, 1], [0], [0]>} : vector<2x8x8xbf16>, vector<2x8x8xbf16>, vector<2x8x8xf32> -> vector<2x8x8xf32>
    "tpu.trace_stop"() : () -> ()
    %c0_11 = arith.constant 0 : index
    %c0_12 = arith.constant 0 : index
    %c0_13 = arith.constant 0 : index
    %14 = vector.load %arg16[%c0_11, %c0_12, %c0_13] : memref<2x8x1xf32, #tpu.memory_space<vmem>>, vector<2x8x1xf32>
    %cst_14 = arith.constant dense<0xFF800000> : vector<2x8xf32>
    %15 = vector.multi_reduction <maximumf>, %13, %cst_14 [2] : vector<2x8x8xf32> to vector<2x8xf32>
    %16 = vector.shape_cast %15 : vector<2x8xf32> to vector<2x8x1xf32>
    %17 = arith.maximumf %14, %16 : vector<2x8x1xf32>
    %18 = arith.subf %14, %17 : vector<2x8x1xf32>
    %19 = math.exp %18 : vector<2x8x1xf32>
    %20 = vector.broadcast %17 : vector<2x8x1xf32> to vector<2x8x8xf32>
    %21 = arith.subf %13, %20 : vector<2x8x8xf32>
    %22 = math.exp %21 : vector<2x8x8xf32>
    %23 = arith.truncf %22 : vector<2x8x8xf32> to vector<2x8x8xbf16>
    %c0_15 = arith.constant 0 : index
    %c0_16 = arith.constant 0 : index
    %c0_17 = arith.constant 0 : index
    %24 = vector.load %arg17[%c0_15, %c0_16, %c0_17] : memref<2x8x1xf32, #tpu.memory_space<vmem>>, vector<2x8x1xf32>
    %25 = arith.mulf %19, %24 : vector<2x8x1xf32>
    %cst_18 = arith.constant dense<0.000000e+00> : vector<2x8xf32>
    %26 = vector.multi_reduction <add>, %22, %cst_18 [2] : vector<2x8x8xf32> to vector<2x8xf32>
    %27 = vector.shape_cast %26 : vector<2x8xf32> to vector<2x8x1xf32>
    %28 = arith.addf %25, %27 : vector<2x8x1xf32>
    %c0_19 = arith.constant 0 : index
    %c0_20 = arith.constant 0 : index
    %c0_21 = arith.constant 0 : index
    %29 = vector.load %arg18[%c0_19, %c0_20, %c0_21] : memref<2x8x8xf32, #tpu.memory_space<vmem>>, vector<2x8x8xf32>
    %30 = vector.broadcast %19 : vector<2x8x1xf32> to vector<2x8x8xf32>
    %31 = arith.mulf %30, %29 : vector<2x8x8xf32>
    "tpu.trace_start"() <{level = 10 : i32, message = "hqk,hkd->hqd"}> : () -> ()
    %cst_22 = arith.constant dense<0.000000e+00> : vector<2x8x8xf32>
    %32 = tpu.matmul %23, %11, %cst_22 {dimension_numbers = #tpu.dot_dimension_numbers<[2], [1], [1], [2], [0, 0, 0, 1, 1, 2], [0], [0]>} : vector<2x8x8xbf16>, vector<2x8x8xbf16>, vector<2x8x8xf32> -> vector<2x8x8xf32>
    "tpu.trace_stop"() : () -> ()
    %33 = arith.addf %31, %32 : vector<2x8x8xf32>
    %c0_23 = arith.constant 0 : index
    %c0_24 = arith.constant 0 : index
    %c0_25 = arith.constant 0 : index
    %34 = vector.load %arg18[%c0_23, %c0_24, %c0_25] : memref<2x8x8xf32, #tpu.memory_space<vmem>>, vector<2x8x8xf32>
    tpu.vector_store %arg18[%c0_23, %c0_24, %c0_25], %33 {strides = array<i32>} : memref<2x8x8xf32, #tpu.memory_space<vmem>>, vector<2x8x8xf32>,
    %c0_26 = arith.constant 0 : index
    %c0_27 = arith.constant 0 : index
    %c0_28 = arith.constant 0 : index
    %35 = vector.load %arg16[%c0_26, %c0_27, %c0_28] : memref<2x8x1xf32, #tpu.memory_space<vmem>>, vector<2x8x1xf32>
    tpu.vector_store %arg16[%c0_26, %c0_27, %c0_28], %17 {strides = array<i32>} : memref<2x8x1xf32, #tpu.memory_space<vmem>>, vector<2x8x1xf32>,
    %c0_29 = arith.constant 0 : index
    %c0_30 = arith.constant 0 : index
    %c0_31 = arith.constant 0 : index
    %36 = vector.load %arg17[%c0_29, %c0_30, %c0_31] : memref<2x8x1xf32, #tpu.memory_space<vmem>>, vector<2x8x1xf32>
    tpu.vector_store %arg17[%c0_29, %c0_30, %c0_31], %28 {strides = array<i32>} : memref<2x8x1xf32, #tpu.memory_space<vmem>>, vector<2x8x1xf32>,
    %c0_i32_32 = arith.constant 0 : i32
    %37 = arith.cmpi eq, %arg2, %c0_i32_32 : i32
    %38 = arith.extui %37 : i1 to i32
    %c0_i32_33 = arith.constant 0 : i32
    %39 = arith.cmpi ne, %38, %c0_i32_33 : i32
    scf.if %39 {
      %c0_34 = arith.constant 0 : index
      %c0_35 = arith.constant 0 : index
      %c0_36 = arith.constant 0 : index
      %40 = vector.load %arg18[%c0_34, %c0_35, %c0_36] : memref<2x8x8xf32, #tpu.memory_space<vmem>>, vector<2x8x8xf32>
      %c0_37 = arith.constant 0 : index
      %c0_38 = arith.constant 0 : index
      %c0_39 = arith.constant 0 : index
      %41 = vector.load %arg17[%c0_37, %c0_38, %c0_39] : memref<2x8x1xf32, #tpu.memory_space<vmem>>, vector<2x8x1xf32>
      %42 = tpu.reciprocal %41 {approx = true} : vector<2x8x1xf32> -> vector<2x8x1xf32>
      %43 = vector.broadcast %42 : vector<2x8x1xf32> to vector<2x8x8xf32>
      %44 = arith.mulf %40, %43 : vector<2x8x8xf32>
      %45 = tpu.transpose %44, [1, 0, 2] : vector<2x8x8xf32> -> vector<8x2x8xf32>
      %46 = vector.shape_cast %45 : vector<8x2x8xf32> to vector<8x16xf32>
      %47 = arith.truncf %46 : vector<8x16xf32> to vector<8x16xbf16>
      %c0_40 = arith.constant 0 : index
      %c0_41 = arith.constant 0 : index
      %48 = vector.load %arg9[%c0_40, %c0_41] : memref<16x32xbf16, #tpu.memory_space<vmem>>, vector<16x32xbf16>
      %cst_42 = arith.constant dense<0.000000e+00> : vector<8x32xf32>
      %49 = tpu.matmul %47, %48, %cst_42 {dimension_numbers = #tpu.dot_dimension_numbers<[1], [0], [0], [1], [0, 0, 1, 1], [], []>} : vector<8x16xbf16>, vector<16x32xbf16>, vector<8x32xf32> -> vector<8x32xf32>
      %c0_43 = arith.constant 0 : index
      %c0_44 = arith.constant 0 : index
      %c0_45 = arith.constant 0 : index
      %50 = vector.load %arg3[%c0_43, %c0_44, %c0_45] : memref<1x8x32xf32, #tpu.memory_space<vmem>>, vector<1x8x32xf32>
      %51 = vector.shape_cast %50 : vector<1x8x32xf32> to vector<8x32xf32>
      %52 = arith.addf %49, %51 : vector<8x32xf32>
      %cst_46 = arith.constant dense<0.000000e+00> : vector<8xf32>
      %53 = vector.multi_reduction <add>, %52, %cst_46 [1] : vector<8x32xf32> to vector<8xf32>
      %54 = vector.shape_cast %53 : vector<8xf32> to vector<8x1xf32>
      %cst_47 = arith.constant 3.200000e+01 : f32
      %55 = vector.broadcast %cst_47 : f32 to vector<8x1xf32>
      %56 = arith.divf %54, %55 : vector<8x1xf32>
      %57 = vector.broadcast %56 : vector<8x1xf32> to vector<8x32xf32>
      %58 = arith.subf %52, %57 : vector<8x32xf32>
      %59 = arith.mulf %58, %58 : vector<8x32xf32>
      %cst_48 = arith.constant dense<0.000000e+00> : vector<8xf32>
      %60 = vector.multi_reduction <add>, %59, %cst_48 [1] : vector<8x32xf32> to vector<8xf32>
      %61 = vector.shape_cast %60 : vector<8xf32> to vector<8x1xf32>
      %cst_49 = arith.constant 3.200000e+01 : f32
      %62 = vector.broadcast %cst_49 : f32 to vector<8x1xf32>
      %63 = arith.divf %61, %62 : vector<8x1xf32>
      %64 = vector.broadcast %56 : vector<8x1xf32> to vector<8x32xf32>
      %65 = arith.subf %52, %64 : vector<8x32xf32>
      %cst_50 = arith.constant 9.99999997E-7 : f32
      %66 = vector.broadcast %cst_50 : f32 to vector<8x1xf32>
      %67 = arith.addf %63, %66 : vector<8x1xf32>
      %68 = math.rsqrt %67 : vector<8x1xf32>
      %69 = vector.broadcast %68 : vector<8x1xf32> to vector<8x32xf32>
      %70 = arith.mulf %65, %69 : vector<8x32xf32>
      %c0_51 = arith.constant 0 : index
      %c0_52 = arith.constant 0 : index
      %71 = vector.load %arg10[%c0_51, %c0_52] : memref<1x32xf32, #tpu.memory_space<vmem>>, vector<1x32xf32>
      %72 = vector.broadcast %71 : vector<1x32xf32> to vector<8x32xf32>
      %73 = arith.mulf %70, %72 : vector<8x32xf32>
      %c0_53 = arith.constant 0 : index
      %c0_54 = arith.constant 0 : index
      %74 = vector.load %arg11[%c0_53, %c0_54] : memref<1x32xf32, #tpu.memory_space<vmem>>, vector<1x32xf32>
      %75 = vector.broadcast %74 : vector<1x32xf32> to vector<8x32xf32>
      %76 = arith.addf %73, %75 : vector<8x32xf32>
      %c0_55 = arith.constant 0 : index
      %c0_56 = arith.constant 0 : index
      %c0_57 = arith.constant 0 : index
      %77 = vector.load %arg12[%c0_55, %c0_56, %c0_57] : memref<1x8x32xf32, #tpu.memory_space<vmem>>, vector<1x8x32xf32>
      %78 = vector.shape_cast %77 : vector<1x8x32xf32> to vector<8x32xf32>
      %79 = vector.shape_cast %76 : vector<8x32xf32> to vector<1x8x32xf32>
      tpu.vector_store %arg12[%c0_55, %c0_56, %c0_57], %79 {strides = array<i32>} : memref<1x8x32xf32, #tpu.memory_space<vmem>>, vector<1x8x32xf32>,
    } else {
    }
    return
  }
  func.func @transform_0(%arg0: i32, %arg1: i32, %arg2: i32) -> (i32, i32, i32) {
    %c0_i32 = arith.constant 0 : i32
    %c0_i32_0 = arith.constant 0 : i32
    return %arg0, %arg1, %c0_i32 : i32, i32, i32
  }
  func.func @transform_1(%arg0: i32, %arg1: i32, %arg2: i32) -> (i32, i32, i32) {
    %c0_i32 = arith.constant 0 : i32
    %c0_i32_0 = arith.constant 0 : i32
    return %arg0, %arg2, %c0_i32 : i32, i32, i32
  }
  func.func @transform_2(%arg0: i32, %arg1: i32, %arg2: i32) -> (i32, i32, i32) {
    %c0_i32 = arith.constant 0 : i32
    %c0_i32_0 = arith.constant 0 : i32
    return %arg0, %arg2, %c0_i32 : i32, i32, i32
  }
  func.func @transform_3(%arg0: i32, %arg1: i32, %arg2: i32) -> (i32, i32) {
    %c0_i32 = arith.constant 0 : i32
    %c0_i32_0 = arith.constant 0 : i32
    %c0_i32_1 = arith.constant 0 : i32
    return %c0_i32, %c0_i32_0 : i32, i32
  }
  func.func @transform_4(%arg0: i32, %arg1: i32, %arg2: i32) -> (i32, i32) {
    %c0_i32 = arith.constant 0 : i32
    %c0_i32_0 = arith.constant 0 : i32
    %c0_i32_1 = arith.constant 0 : i32
    return %c0_i32, %c0_i32_0 : i32, i32
  }
  func.func @transform_5(%arg0: i32, %arg1: i32, %arg2: i32) -> (i32, i32) {
    %c0_i32 = arith.constant 0 : i32
    %c0_i32_0 = arith.constant 0 : i32
    %c0_i32_1 = arith.constant 0 : i32
    return %c0_i32, %c0_i32_0 : i32, i32
  }
  func.func @transform_6(%arg0: i32, %arg1: i32, %arg2: i32) -> (i32, i32) {
    %c0_i32 = arith.constant 0 : i32
    %c0_i32_0 = arith.constant 0 : i32
    %c0_i32_1 = arith.constant 0 : i32
    return %c0_i32, %c0_i32_0 : i32, i32
  }
  func.func @transform_7(%arg0: i32, %arg1: i32, %arg2: i32) -> (i32, i32) {
    %c0_i32 = arith.constant 0 : i32
    %c0_i32_0 = arith.constant 0 : i32
    %c0_i32_1 = arith.constant 0 : i32
    return %c0_i32, %c0_i32_0 : i32, i32
  }
  func.func @transform_8(%arg0: i32, %arg1: i32, %arg2: i32) -> (i32, i32) {
    %c0_i32 = arith.constant 0 : i32
    %c0_i32_0 = arith.constant 0 : i32
    %c0_i32_1 = arith.constant 0 : i32
    return %c0_i32, %c0_i32_0 : i32, i32
  }
  func.func @transform_9(%arg0: i32, %arg1: i32, %arg2: i32) -> (i32, i32, i32) {
    %c0_i32 = arith.constant 0 : i32
    %c0_i32_0 = arith.constant 0 : i32
    return %arg0, %arg1, %c0_i32 : i32, i32, i32
  }
}

</mosaic_0001>

<bundles_post_ra>
// kernel: tpu_custom_call.1
= control target key start
LH: loop header
LB: loop body
LE: loop exit
PB: predicated region body
PF: predicated region fallthrough
CT: control target
= control target key end

     0   :  { %14 = vsyncpa [#allocation9], 0  ;;  %s1910_s0 = inlined_call_operand.vmem [shape: f32[2,8,32], index: 0, kind: input, shape index: {}]   ;;  %s1911_s1 = inlined_call_operand.vmem [shape: bf16[2,8,32], index: 1, kind: input, shape index: {}]   ;;  %s1912_s2 = inlined_call_operand.vmem [shape: bf16[2,8,32], index: 2, kind: input, shape index: {}]   ;;  %s1913_s3 = inlined_call_operand.vmem [shape: bf16[32,16], index: 3, kind: input, shape index: {}]   ;;  %s1914_s4 = inlined_call_operand.vmem [shape: bf16[32,16], index: 4, kind: input, shape index: {}]   ;;  %s1915_s5 = inlined_call_operand.vmem [shape: bf16[32,16], index: 5, kind: input, shape index: {}]   ;;  %s1916_s6 = inlined_call_operand.vmem [shape: bf16[16,32], index: 6, kind: input, shape index: {}]   ;;  %s1917_s7 = inlined_call_operand.vmem [shape: f32[1,32], index: 7, kind: input, shape index: {}]   ;;  %s1918_s8 = inlined_call_operand.vmem [shape: f32[1,32], index: 8, kind: input, shape index: {}]   ;;  %s1919_s9 = inlined_call_operand.hbm [shape: f32[2,8,32], index: 9, kind: output, shape index: {}]  }
   0x1   :  { %16 = vsyncpa [#allocation9 + $0x1], 0  ;;  %s1589_s30 = smov 0   ;;  %s1591_s10 = smov 0  }
   0x2   :  { %s1593_s11 = smov 0   ;;  %s1595_s12 = smov 0  }
   0x3   :  { %s1597_s13 = smov 0   ;;  %s1599_s14 = smov 0  }
   0x4 LB: > { %s1311_s15 = sadd.s32 4294967295, %s1529_s14   ;;  %s1312_s16 = sadd.s32 4294967294, %s1529_s14   ;;  %s1529_s14 = sphi %s1599_s14, %s22_s14   ;;  %s1525_s13 = sphi %s1597_s13, %s1929_s13   ;;  %s1521_s12 = sphi %s1595_s12, %s1928_s12   ;;  %s1517_s11 = sphi %s1593_s11, %s1927_s11   ;;  %s1513_s10 = sphi %s1591_s10, %s1926_s10   ;;  %s1509_s30 = sphi %s1589_s30, %s1925_s30  }
   0x5   : > { %s41_s17 = sadd.s32 1, %s1525_s13  ;;  %s260_s18 = sadd.s32 1, %s1517_s11 }
   0x6   : > { %p43_p0 = scmp.ge.s32.totalorder %s41_s17, 2  ;;  %p270_p1 = scmp.ne.s32.totalorder %s1517_s11, %s1513_s10 }
   0x7   : > { %p271_p2 = scmp.eq.s32.totalorder %s1311_s15, 1  ;;  %p276_p3 = scmp.ne.s32.totalorder %s1513_s10, %s1509_s30 }
   0x8   : > { %s1931_s17 = smov (%p43_p0, %s41_s17), 0  ;;  %p277_p5 = scmp.eq.s32.totalorder %s1312_s16, 1 }
   0x9   : > { %1921 = sst [smem:[#allocation11_spill]] %s1931_s17  ;;  %p1629_p4 = por %p271_p2, %p270_p1 }
   0xa   : > { %s255_s20 = ssub.s32 %s1525_s13, %s1931_s17  ;;  %p1315_p6 = scmp.ge.s32.totalorder %s1529_s14, 1 }
   0xb   : > { %p258_p7 = scmp.eq.s32.totalorder %s255_s20, 0  ;;  %p1636_p8 = por %p277_p5, %p276_p3 }
   0xc   : > { %p343_p9 = scmp.lt.s32.totalorder %s1529_s14, 3 }
   0xd   : > { %s1642_s22 = scalar_select %p258_p7, %s1517_s11, %s260_s18  }
   0xe   : > { %p344_p10 = pnand %p1315_p6, %p343_p9 }
   0xf   : > { %p395_p11 = scmp.lt.s32.totalorder (!%p344_p10), %s1521_s12, 1  ;;  %s1531_s28 = smov (!%p344_p10), 120  }
  0x10   : > { %347 = sbr.rel (%p344_p10) target bundleno = 1494 (0x5d6), region = 56  ;;  %s1537_s26 = smov (!%p344_p10), 8  }
  0x11   : > { %s1357_s17 = sshll.u32 (!%p344_p10), %s1521_s12, 3 }
  0x12   : > { %s1194_s24 = scalar_lea.hbm (!%p344_p10), %s1919_s9, %s1357_s17 }
  0x15   : > { %v1361_v0 = vld [vmem:[%s1914_s4 + $0x8] sm:$0xff]  ;;  %v1360_v2 = vld [vmem:[%s1914_s4] sm:$0xff]  ;;  %s1658_s16 = scalar_select %p395_p11, %s1521_s12, 1  ;;  %vm438_vm0 = vcmask 261120   ;;  %v1532_v12 = vmov 1983009808  }
  0x16   : > { %v1365_v1 = vld [vmem:[%s1913_s3 + $0x8] sm:$0xff]  ;;  %448 = vmatpush.bf16.msra.mxu0 %v1361_v0  ;;  %v1364_v3 = vld [vmem:[%s1913_s3] sm:$0xff]  ;;  %v496_v13 = vunpack.c.l.s4 %v1532_v12  ;;  %vm493_vm1 = vcmask 1047556   ;;  %v1533_v16 = vmov 1934713408   ;;  %vm588_vm2 = vcmask 60416  }
  0x17   : > { %723 = vmatpush.bf16.msra.mxu2 %v1365_v1  ;;  %s1318_s18 = sshll.u32 %s1658_s16, 2  ;;  %s1317_s20 = sshll.u32 %s1658_s16, 3  ;;  %v518_v17 = vunpack.c.l.s4 %v1533_v16  ;;  %v1363_v62 = vld [vmem:[%s1915_s5 + $0x8] sm:$0xff]  ;;  %vm836_vm3 = vcmask 64512   ;;  %vm831_vm4 = vcmask 7168   ;;  %vm952_vm5 = vcmask 1043456  }
  0x18   : > { %s408_s25 = scalar_lea.vmem %s1911_s1, %s1318_s18  ;;  %s401_s27 = scalar_lea.vmem %s1910_s0, %s1317_s20  ;;  %v1678_v15 = vunpack.c.0.s8 %v496_v13  ;;  %481 = vmatpush.bf16.msra.mxu1 %v1363_v62  ;;  %vm1124_vm6 = vcmask 130048  }
  0x19   : > { %v421_v4 = vld [vmem:[%s408_s25] sm:$0xf]  ;;  %v1683_v22 = vunpack.c.0.s8 %v518_v17  ;;  %s415_s25 = scalar_lea.vmem %s1912_s2, %s1318_s18 }
  0x1a   : > { %449 = vmatpush.bf16.msra.mxu0 %v1360_v2  ;;  %v1670_v5 = vld [vmem:[%s401_s27] sm:$0xff]  ;;  %s392_s27 = sand.u32 1, %s1513_s10  }
  0x1b   : > { %724 = vmatpush.bf16.msra.mxu2 %v1364_v3  ;;  %v696_v6 = vpack.c.bf16 %v1670_v5, %v1670_v5  ;;  %s1183_s29 = scalar_lea.sflag [#allocation9], %s392_s27 }
  0x1d   : > { %1328 = vmatmul.msk.bf16.vlgmr.msra.gmra.mxu0 %vm438_vm0, %v421_v4 }
  0x1e   : > { %1346 = vmatmul.msk.bf16.vlgmr.msra.gmra.mxu2 %vm438_vm0, %v696_v6 }
  0x9a   : > { %v451_v7 = vpop.f32.mrf.mxu0 }
  0x9b   : > { %489 = vrot.lane.b32.xlu0 %v451_v7, %s1531_s28  ;;  %v492_v14 = vrot.slane %v451_v7, 4  ;;  %v498_v19 = vperm.slane %v451_v7, %v1678_v15 }
  0x9d   : > { %v494_v18 = vsel %vm493_vm1, 0.0, %v492_v14  ;;  %v515_v24 = vrot.slane %v498_v19, 4 }
  0x9e   : > { %v502_v20 = vperm.slane %v494_v18, %v1678_v15 }
  0xa0   : > { %v527_v30 = vrot.slane %v502_v20, 4 }
  0xa1   : > { %v726_v8 = vpop.f32.mrf.mxu2 }
  0xa2   : > { %v730_v9 = vmul.f32 0.35355338, %v726_v8  ;;  %v453_v10 = vpop.f32.mrf.mxu0  ;;  %v1362_v8 = vld [vmem:[%s1915_s5] sm:$0xff] }
  0xa3   : > { %482 = vmatpush.bf16.msra.mxu1 %v1362_v8 }
  0xa4   : > { %732 = vrot.lane.b32.xlu0 %v730_v9, %s1531_s28  ;;  %v735_v21 = vrot.slane %v730_v9, 4  ;;  %v741_v34 = vperm.slane %v730_v9, %v1678_v15 }
  0xa6   : > { %v737_v31 = vsel %vm493_vm1, 0.0, %v735_v21  ;;  %v758_v50 = vrot.slane %v741_v34, 4 }
  0xa7   : > { %v745_v40 = vperm.slane %v737_v31, %v1678_v15 }
  0xa9   : > { %v728_v11 = vpop.f32.mrf.mxu2  ;;  %v770_v54 = vrot.slane %v745_v40, 4 }
 0x10d   : > { %v490_v23 = vpop.permute.xlu0 %489 }
 0x10e   : > { %v503_v25 = vrot.slane %v490_v23, 4  ;;  %v508_v26 = vperm.slane %v490_v23, %v1678_v15 }
 0x110   : > { %v504_v27 = vsel %vm493_vm1, 0.0, %v503_v25  ;;  %v513_v28 = vrot.slane %v508_v26, 4  ;;  %v516_v29 = vsel %vm493_vm1, %v508_v26, %v515_v24 }
 0x111   : > { %v512_v32 = vperm.slane %v504_v27, %v1678_v15  ;;  %v524_v33 = vperm.slane %v516_v29, %v1683_v22  ;;  %v455_v27 = vld [vmem:[%s415_s25] sm:$0xf] }
 0x112   : > { %v514_v35 = vsel %vm493_vm1, %v513_v28, %v498_v19  ;;  %1337 = vmatmul.msk.bf16.vlgmr.msra.gmra.mxu1 %vm438_vm0, %v455_v27 }
 0x113   : > { %v520_v36 = vperm.slane %v514_v35, %v1683_v22  ;;  %v525_v37 = vrot.slane %v512_v32, 4  ;;  %v528_v38 = vsel %vm493_vm1, %v512_v32, %v527_v30  ;;  %v539_v39 = vrot.slane %v524_v33, 4 }
 0x114   : > { %v536_v41 = vperm.slane %v528_v38, %v1683_v22 }
 0x115   : > { %v526_v42 = vsel %vm493_vm1, %v525_v37, %v502_v20  ;;  %v537_v43 = vrot.slane %v520_v36, 4  ;;  %v540_v44 = vsel %vm493_vm1, 0.0, %v539_v39  ;;  %v545_v48 = vsel %vm493_vm1, %v539_v39, %v520_v36 }
 0x116   : > { %v733_v45 = vpop.permute.xlu0 %732  ;;  %v532_v46 = vperm.slane %v526_v42, %v1683_v22  ;;  %v543_v47 = vrot.slane %v536_v41, 4  ;;  %v550_v49 = vrot.slane %v540_v44, 4  ;;  %v549_v58 = vperm.slane %v545_v48, %v1678_v15 }
 0x117   : > { %v538_v51 = vsel %vm493_vm1, 0.0, %v537_v43  ;;  %v746_v52 = vrot.slane %v733_v45, 4  ;;  %v751_v53 = vperm.slane %v733_v45, %v1678_v15 }
 0x118   : > { %v541_v55 = vrot.slane %v532_v46, 4  ;;  %v544_v56 = vsel %vm493_vm1, 0.0, %v543_v47  ;;  %v551_v57 = vsel %vm493_vm1, %v550_v49, %v538_v51  ;;  %v556_v3 = vsel %vm493_vm1, %v543_v47, %v532_v46 }
 0x119   : > { %v555_v59 = vperm.slane %v551_v57, %v1678_v15  ;;  %v561_v60 = vrot.slane %v544_v56, 4  ;;  %v747_v61 = vsel %vm493_vm1, 0.0, %v746_v52  ;;  %v756_v1 = vrot.slane %v751_v53, 4 }
 0x11a   : > { %v542_v63 = vsel %vm493_vm1, 0.0, %v541_v55  ;;  %v755_v0 = vperm.slane %v747_v61, %v1678_v15  ;;  %v759_v2 = vsel %vm493_vm1, %v751_v53, %v758_v50  ;;  %v560_v18 = vperm.slane %v556_v3, %v1678_v15 }
 0x11b   : > { %v562_v4 = vsel %vm493_vm1, %v561_v60, %v542_v63  ;;  %v567_v6 = vrot.slane %v555_v59, 4  ;;  %v767_v7 = vperm.slane %v759_v2, %v1683_v22  ;;  %v757_v10 = vsel %vm493_vm1, %v756_v1, %v741_v34 }
 0x11c   : > { %v566_v9 = vperm.slane %v562_v4, %v1678_v15  ;;  %v768_v11 = vrot.slane %v755_v0, 4  ;;  %v771_v12 = vsel %vm493_vm1, %v755_v0, %v770_v54  ;;  %v763_v14 = vperm.slane %v757_v10, %v1683_v22 }
 0x11d   : > { %v568_v13 = vsel %vm493_vm1, %v567_v6, %v549_v58  ;;  %v779_v16 = vperm.slane %v771_v12, %v1683_v22  ;;  %v782_v17 = vrot.slane %v767_v7, 4  ;;  %v1534_v6 = vmov -inf  }
 0x11e   : > { %v572_v19 = vperm.slane %v568_v13, %v1683_v22  ;;  %v573_v20 = vrot.slane %v566_v9, 4  ;;  %v769_v21 = vsel %vm493_vm1, %v768_v11, %v745_v40  ;;  %v780_v24 = vrot.slane %v763_v14, 4  ;;  %833 = vst.msk [vmem:[#allocation5 + $0x8] sm:$0xff] %vm831_vm4, %v1534_v6 }
 0x11f   : > { %v775_v23 = vperm.slane %v769_v21, %v1683_v22  ;;  %v783_v25 = vsel %vm493_vm1, 0.0, %v782_v17  ;;  %v786_v26 = vrot.slane %v779_v16, 4  ;;  %v788_v35 = vsel %vm493_vm1, %v782_v17, %v763_v14  ;;  %832 = vst.msk [vmem:[#allocation5] sm:$0xff] %vm831_vm4, %v1534_v6 }
 0x120   : > { %v574_v28 = vsel %vm493_vm1, %v573_v20, %v560_v18  ;;  %v581_v29 = vrot.slane %v572_v19, 4  ;;  %v793_v30 = vrot.slane %v783_v25, 4  ;;  %v781_v32 = vsel %vm493_vm1, 0.0, %v780_v24 }
 0x121   : > { %v578_v31 = vperm.slane %v574_v28, %v1683_v22  ;;  %v784_v33 = vrot.slane %v775_v23, 4  ;;  %v787_v34 = vsel %vm493_vm1, 0.0, %v786_v26  ;;  %v799_v43 = vsel %vm493_vm1, %v786_v26, %v775_v23 }
 0x122   : > { %v794_v36 = vsel %vm493_vm1, %v793_v30, %v781_v32  ;;  %v804_v37 = vrot.slane %v787_v34, 4  ;;  %v792_v46 = vperm.slane %v788_v35, %v1678_v15  ;;  %v803_v50 = vperm.slane %v799_v43, %v1678_v15 }
 0x123   : > { %v579_v38 = vrot.slane %v578_v31, 4  ;;  %v582_v39 = vsel %vm493_vm1, %v578_v31, %v581_v29  ;;  %v785_v40 = vsel %vm493_vm1, 0.0, %v784_v33  ;;  %v798_v41 = vperm.slane %v794_v36, %v1678_v15 }
 0x124   : > { %v584_v42 = vpack.c.bf16 %v582_v39, %v582_v39  ;;  %v805_v44 = vsel %vm493_vm1, %v804_v37, %v785_v40  ;;  %v1535_v14 = vmov 0   ;;  %v1536_v16 = vmov 0.0  }
 0x125   : > { %v580_v45 = vsel %vm493_vm1, %v579_v38, %v572_v19  ;;  %v809_v47 = vperm.slane %v805_v44, %v1678_v15  ;;  %v810_v48 = vrot.slane %v798_v41, 4  ;;  %1430 = vset.pattern.permute.xlu2 %v1535_v14  ;;  %1431 = vset.pattern.permute.xlu0 %v1535_v14  ;;  %838 = vst.msk [vmem:[#allocation7 + $0x8] sm:$0xff] %vm836_vm3, %v1536_v16 }
 0x126   : > { %v583_v49 = vpack.c.bf16 %v580_v45, %v580_v45  ;;  %590 = vst.msk [vmem:[#allocation3 + $0x4] sm:$0xf] %vm588_vm2, %v584_v42  ;;  %1432 = vset.pattern.permute.xlu1 %v1535_v14 }
 0x127   : > { %v811_v51 = vsel %vm493_vm1, %v810_v48, %v792_v46  ;;  %v816_v52 = vrot.slane %v809_v47, 4  ;;  %834 = vst.msk [vmem:[#allocation6] sm:$0xff] %vm831_vm4, %v1536_v16  ;;  %v890_v46 = vld [vmem:[#allocation5 + $0x8] sm:$0xff] }
 0x128   : > { %589 = vst.msk [vmem:[#allocation3] sm:$0xf] %vm588_vm2, %v583_v49  ;;  %v815_v53 = vperm.slane %v811_v51, %v1683_v22 }
 0x129   : > { %v817_v54 = vsel %vm493_vm1, %v816_v52, %v803_v50  ;;  %835 = vst.msk [vmem:[#allocation6 + $0x8] sm:$0xff] %vm831_vm4, %v1536_v16 }
 0x12a   : > { %v821_v55 = vperm.slane %v817_v54, %v1683_v22  ;;  %v824_v56 = vrot.slane %v815_v53, 4  ;;  %837 = vst.msk [vmem:[#allocation7] sm:$0xff] %vm836_vm3, %v1536_v16 }
 0x12c   : > { %v822_v57 = vrot.slane %v821_v55, 4  ;;  %v825_v58 = vsel %vm493_vm1, %v821_v55, %v824_v56 }
 0x12d   : > { %v827_v59 = vpack.c.bf16 %v825_v58, %v825_v58  ;;  %v843_v60 = vld [vmem:[#allocation3 + $0x4] sm:$0xf] }
 0x12e   : > { %v823_v61 = vsel %vm493_vm1, %v822_v57, %v815_v53  ;;  %v874_v62 = vsel %vm836_vm3, %v843_v60, 0 }
 0x12f   : > { %v826_v63 = vpack.c.bf16 %v823_v61, %v823_v61  ;;  %830 = vst.msk [vmem:[#allocation2 + $0x4] sm:$0xf] %vm588_vm2, %v827_v59  ;;  %883 = vmatpush.bf16.xpose.msrb.mxu0 %v874_v62  ;;  %v842_v0 = vld [vmem:[#allocation3] sm:$0xf] }
 0x130   : > { %v855_v1 = vsel %vm836_vm3, %v842_v0, 0 }
 0x131   : > { %829 = vst.msk [vmem:[#allocation2] sm:$0xf] %vm588_vm2, %v826_v63  ;;  %864 = vmatpush.bf16.xpose.msra.mxu3 %v855_v1  ;;  %v889_v1 = vld [vmem:[#allocation5] sm:$0xff] }
 0x136   : > { %v849_v2 = vld [vmem:[#allocation2 + $0x4] sm:$0xf] }
 0x137   : > { %1348 = vmatmul.msk.bf16.vlgmr.msrb.gmra.mxu0 %vm836_vm3, %v849_v2 }
 0x138   : > { %v848_v3 = vld [vmem:[#allocation2] sm:$0xf] }
 0x139   : > { %1347 = vmatmul.msk.bf16.vlgmr.msra.gmra.mxu3 %vm836_vm3, %v848_v3 }
 0x18f   : > { %v484_v4 = vpop.f32.mrf.mxu1 }
 0x190   : > { %592 = vrot.lane.b32.xlu2 %v484_v4, %s1531_s28  ;;  %v595_v17 = vrot.slane %v484_v4, 4  ;;  %v600_v19 = vperm.slane %v484_v4, %v1678_v15  ;;  %s1316_s28 = sshll.u32 %s392_s27, 3 }
 0x191   : > { %s394_s18 = scalar_lea.vmem [#allocation8], %s1316_s28  ;;  %s1471_s28 = scalar_lea.hbm %s1919_s9, 16 }
 0x192   : > { %v596_v18 = vsel %vm493_vm1, 0.0, %v595_v17  ;;  %v617_v21 = vrot.slane %v600_v19, 4  ;;  %s1196_s12 = sshll.u32 %s394_s18, 4  ;;  %s1197_s12 = int_to_ptr.vmem [resolvable:$true] %s1196_s12 }
 0x193   : > { %v604_v20 = vperm.slane %v596_v18, %v1678_v15 }
 0x195   : > { %v629_v26 = vrot.slane %v604_v20, 4 }
 0x197   : > { %v486_v7 = vpop.f32.mrf.mxu1 }
 0x1b4   : > { %v1769_v8 = vpop.f32.mrf.mxu0 }
 0x1b5   : > { %v894_v9 = vsel %vm836_vm3, %v1769_v8, -inf }
 0x1b6   : > { %895 = vmax.xlane.f32.xlu1 %v894_v9 }
 0x1bc   : > { %v1773_v10 = vpop.f32.mrf.mxu3  ;;  %v887_v11 = vpop.f32.mrf.mxu0 }
 0x1bd   : > { %v891_v12 = vsel %vm836_vm3, %v1773_v10, -inf }
 0x1be   : > { %892 = vmax.xlane.f32.xlu1 %v891_v12 }
 0x1c4   : > { %v868_v13 = vpop.f32.mrf.mxu3 }
 0x1ea   : > { %v593_v23 = vpop.permute.xlu2 %592 }
 0x1eb   : > { %v605_v24 = vrot.slane %v593_v23, 4  ;;  %v610_v25 = vperm.slane %v593_v23, %v1678_v15 }
 0x1ed   : > { %v606_v27 = vsel %vm493_vm1, 0.0, %v605_v24  ;;  %v615_v28 = vrot.slane %v610_v25, 4  ;;  %v618_v29 = vsel %vm493_vm1, %v610_v25, %v617_v21 }
 0x1ee   : > { %v614_v30 = vperm.slane %v606_v27, %v1678_v15  ;;  %v626_v31 = vperm.slane %v618_v29, %v1683_v22 }
 0x1ef   : > { %v616_v32 = vsel %vm493_vm1, %v615_v28, %v600_v19 }
 0x1f0   : > { %v622_v33 = vperm.slane %v616_v32, %v1683_v22  ;;  %v627_v34 = vrot.slane %v614_v30, 4  ;;  %v630_v35 = vsel %vm493_vm1, %v614_v30, %v629_v26  ;;  %v641_v36 = vrot.slane %v626_v31, 4 }
 0x1f1   : > { %v638_v37 = vperm.slane %v630_v35, %v1683_v22 }
 0x1f2   : > { %v628_v38 = vsel %vm493_vm1, %v627_v34, %v604_v20  ;;  %v639_v39 = vrot.slane %v622_v33, 4  ;;  %v642_v40 = vsel %vm493_vm1, 0.0, %v641_v36  ;;  %v647_v43 = vsel %vm493_vm1, %v641_v36, %v622_v33 }
 0x1f3   : > { %v634_v41 = vperm.slane %v628_v38, %v1683_v22  ;;  %v645_v42 = vrot.slane %v638_v37, 4  ;;  %v652_v44 = vrot.slane %v642_v40, 4  ;;  %v651_v50 = vperm.slane %v647_v43, %v1678_v15  ;;  %v924_v37 = vld [vmem:[#allocation6 + $0x8] sm:$0xff] }
 0x1f4   : > { %v640_v45 = vsel %vm493_vm1, 0.0, %v639_v39 }
 0x1f5   : > { %v643_v47 = vrot.slane %v634_v41, 4  ;;  %v646_v48 = vsel %vm493_vm1, 0.0, %v645_v42  ;;  %v653_v49 = vsel %vm493_vm1, %v652_v44, %v640_v45  ;;  %v658_v52 = vsel %vm493_vm1, %v645_v42, %v634_v41 }
 0x1f6   : > { %v657_v51 = vperm.slane %v653_v49, %v1678_v15  ;;  %v663_v53 = vrot.slane %v646_v48, 4  ;;  %v662_v59 = vperm.slane %v658_v52, %v1678_v15 }
 0x1f7   : > { %v644_v55 = vsel %vm493_vm1, 0.0, %v643_v47 }
 0x1f8   : > { %v664_v57 = vsel %vm493_vm1, %v663_v53, %v644_v55  ;;  %v669_v58 = vrot.slane %v657_v51, 4  ;;  %v935_v55 = vld [vmem:[#allocation7] sm:$0xff] }
 0x1f9   : > { %v668_v60 = vperm.slane %v664_v57, %v1678_v15 }
 0x1fa   : > { %v670_v61 = vsel %vm493_vm1, %v669_v58, %v651_v50 }
 0x1fb   : > { %v674_v63 = vperm.slane %v670_v61, %v1683_v22  ;;  %v675_v0 = vrot.slane %v668_v60, 4 }
 0x1fd   : > { %v676_v2 = vsel %vm493_vm1, %v675_v0, %v662_v59  ;;  %v683_v3 = vrot.slane %v674_v63, 4 }
 0x1fe   : > { %v680_v4 = vperm.slane %v676_v2, %v1683_v22 }
 0x200   : > { %v681_v11 = vrot.slane %v680_v4, 4  ;;  %v684_v12 = vsel %vm493_vm1, %v680_v4, %v683_v3 }
 0x201   : > { %v686_v13 = vpack.c.bf16 %v684_v12, %v684_v12 }
 0x202   : > { %v682_v16 = vsel %vm493_vm1, %v681_v11, %v674_v63  ;;  %v1366_v63 = vld [vmem:[%s1916_s6] sm:$0xff] }
 0x203   : > { %v685_v17 = vpack.c.bf16 %v682_v16, %v682_v16  ;;  %690 = vst.msk [vmem:[#allocation4 + $0x4] sm:$0xf] %vm588_vm2, %v686_v13  ;;  %1135 = vmatpush.bf16.msrb.mxu3 %v1366_v63 }
 0x205   : > { %689 = vst.msk [vmem:[#allocation4] sm:$0xf] %vm588_vm2, %v685_v17 }
 0x20a   : > { %v847_v19 = vld [vmem:[#allocation4 + $0x4] sm:$0xf] }
 0x20b   : > { %v973_v20 = vsel %vm952_vm5, %v847_v19, 0 }
 0x20c   : > { %v846_v21 = vld [vmem:[#allocation4] sm:$0xf]  ;;  %982 = vmatpush.bf16.msrb.mxu2 %v973_v20 }
 0x20d   : > { %v954_v23 = vsel %vm952_vm5, %v846_v21, 0 }
 0x20e   : > { %963 = vmatpush.bf16.msrb.mxu1 %v954_v23 }
 0x229   : > { %v896_v54 = vpop.xlane.xlu1 %895 }
 0x22a   : > { %v898_v56 = vmax.f32 %v890_v46, %v896_v54 }
 0x22c   : > { %994 = vst.msk [vmem:[#allocation5 + $0x8] sm:$0xff] %vm831_vm4, %v898_v56  ;;  %912 = vperm.xlu2 %1430, %v898_v56   ;;  %v900_v62 = vsub.f32 %v890_v46, %v898_v56  ;;  %v923_v46 = vld [vmem:[#allocation6] sm:$0xff] }
 0x22e   : > { %v903_v6 = vmul.f32 1.442695, %v900_v62 }
 0x230   : > { %1435 = vpow2.f32 %v903_v6 }
 0x231   : > { %v893_v7 = vpop.xlane.xlu1 %892 }
 0x232   : > { %v897_v9 = vmax.f32 %v889_v1, %v893_v7 }
 0x234   : > { %v899_v14 = vsub.f32 %v889_v1, %v897_v9  ;;  %993 = vst.msk [vmem:[#allocation5] sm:$0xff] %vm831_vm4, %v897_v9  ;;  %907 = vperm.xlu0 %1431, %v897_v9  }
 0x236   : > { %v1436_v18 = vpop.eup %1435 }
 0x237   : > { %v926_v38 = vmul.f32 %v1436_v18, %v924_v37 }
 0x23c   : > { %944 = vperm.xlu0 %1431, %v1436_v18  }
 0x286   : > { %v913_v24 = vpop.permute.xlu2 %912 }
 0x287   : > { %v916_v25 = vsub.f32 %v1769_v8, %v913_v24  ;;  %v901_v8 = vmul.f32 1.442695, %v899_v14 }
 0x289   : > { %v919_v26 = vmul.f32 1.442695, %v916_v25 }
 0x28b   : > { %1437 = vpow2.f32 %v919_v26 }
 0x291   : > { %v1438_v27 = vpop.eup %1437 }
 0x292   : > { %v930_v28 = vsel %vm836_vm3, %v1438_v27, 0.0  ;;  %v922_v29 = vpack.c.bf16 %v1438_v27, %v1438_v27 }
 0x293   : > { %931 = vadd.xlane.f32.xlu2 %v930_v28 }
 0x294   : > { %1350 = vmatmul.msk.bf16.vlgmr.msrb.gmra.mxu2 %vm836_vm3, %v922_v29 }
 0x2a6   : > { %v908_v30 = vpop.permute.xlu0 %907 }
 0x2a7   : > { %v915_v31 = vsub.f32 %v1773_v10, %v908_v30  ;;  %v936_v10 = vld [vmem:[#allocation7 + $0x8] sm:$0xff] }
 0x2a9   : > { %v917_v32 = vmul.f32 1.442695, %v915_v31 }
 0x2ab   : > { %1439 = vpow2.f32 %v917_v32 }
 0x2ac   : > { %1441 = vpow2.f32 %v901_v8 }
 0x2ae   : > { %v945_v41 = vpop.permute.xlu0 %944 }
 0x2af   : > { %v948_v42 = vmul.f32 %v945_v41, %v936_v10 }
 0x2b1   : > { %v1440_v33 = vpop.eup %1439 }
 0x2b2   : > { %v927_v34 = vsel %vm836_vm3, %v1440_v33, 0.0  ;;  %v921_v35 = vpack.c.bf16 %v1440_v33, %v1440_v33  ;;  %v1442_v36 = vpop.eup %1441 }
 0x2b3   : > { %928 = vadd.xlane.f32.xlu1 %v927_v34  ;;  %v925_v47 = vmul.f32 %v1442_v36, %v923_v46 }
 0x2b4   : > { %1349 = vmatmul.msk.bf16.vlgmr.msrb.gmra.mxu1 %vm836_vm3, %v921_v35 }
 0x2cc   : > { %939 = vperm.xlu1 %1432, %v1442_v36  }
 0x306   : > { %v932_v39 = vpop.xlane.xlu2 %931 }
 0x307   : > { %v934_v40 = vadd.f32 %v932_v39, %v926_v38 }
 0x309   : > { %996 = vst.msk [vmem:[#allocation6 + $0x8] sm:$0xff] %vm831_vm4, %v934_v40 }
 0x310   : > { %v1003_v52 = vld [vmem:[#allocation6 + $0x8] sm:$0xff] }
 0x317   : > { %v984_v43 = vpop.f32.mrf.mxu2 }
 0x318   : > { %v989_v44 = vadd.f32 %v984_v43, %v948_v42 }
 0x31a   : > { %991 = vst.msk [vmem:[#allocation7 + $0x8] sm:$0xff] %vm836_vm3, %v989_v44 }
 0x31f   : > { %v986_v45 = vpop.f32.mrf.mxu2 }
 0x321   : > { %v1001_v4 = vld [vmem:[#allocation7 + $0x8] sm:$0xff] }
 0x326   : > { %v929_v48 = vpop.xlane.xlu1 %928 }
 0x327   : > { %v933_v49 = vadd.f32 %v929_v48, %v925_v47 }
 0x329   : > { %995 = vst.msk [vmem:[#allocation6] sm:$0xff] %vm831_vm4, %v933_v49 }
 0x330   : > { %v1002_v50 = vld [vmem:[#allocation6] sm:$0xff] }
 0x331   : > { %v965_v51 = vpop.f32.mrf.mxu1  ;;  %1443 = vrcp.f32 %v1002_v50 }
 0x332   : > { %1445 = vrcp.f32 %v1003_v52 }
 0x337   : > { %v1444_v53 = vpop.eup %1443 }
 0x338   : > { %1008 = vperm.xlu0 %1431, %v1444_v53   ;;  %v1446_v57 = vpop.eup %1445 }
 0x339   : > { %v967_v54 = vpop.f32.mrf.mxu1 }
 0x33e   : > { %v940_v56 = vpop.permute.xlu1 %939 }
 0x33f   : > { %v947_v58 = vmul.f32 %v940_v56, %v935_v55 }
 0x340   : > { %1013 = vperm.xlu0 %1431, %v1446_v57  }
 0x341   : > { %v988_v59 = vadd.f32 %v965_v51, %v947_v58 }
 0x343   : > { %990 = vst.msk [vmem:[#allocation7] sm:$0xff] %vm836_vm3, %v988_v59  ;;  %v1538_v59 = vmov 32.0  }
 0x344   : > { %1447 = vrcp.f32 %v1538_v59 }
 0x34a   : > { %v1000_v60 = vld [vmem:[#allocation7] sm:$0xff] }
 0x3aa   : > { %v1009_v61 = vpop.permute.xlu0 %1008 }
 0x3ab   : > { %v1016_v62 = vmul.f32 %v1009_v61, %v1000_v60  ;;  %v1448_v60 = vpop.eup %1447 }
 0x3ac   : > { %v1146_v61 = vmul.f32 32.0, %v1448_v60  ;;  %vm1150_vm7 = vweird.f32 %v1448_v60 }
 0x3ad   : > { %v1018_v0 = vrot.slane %v1016_v62, 4  ;;  %v1024_v2 = vperm.slane %v1016_v62, %v1678_v15 }
 0x3ae   : > { %v1147_v62 = vsub.f32 1.0, %v1146_v61 }
 0x3af   : > { %v1020_v1 = vsel %vm493_vm1, 0.0, %v1018_v0  ;;  %v1041_v9 = vrot.slane %v1024_v2, 4 }
 0x3b0   : > { %v1028_v7 = vperm.slane %v1020_v1, %v1678_v15  ;;  %v1148_v63 = vmul.f32 %v1448_v60, %v1147_v62 }
 0x3b2   : > { %v1014_v3 = vpop.permute.xlu0 %1013  ;;  %v1053_v17 = vrot.slane %v1028_v7, 4  ;;  %v1149_v0 = vadd.f32 %v1448_v60, %v1148_v63 }
 0x3b3   : > { %v1017_v6 = vmul.f32 %v1014_v3, %v1001_v4 }
 0x3b4   : > { %v1151_v1 = vsel %vm1150_vm7, %v1448_v60, %v1149_v0 }
 0x3b5   : > { %v1029_v11 = vrot.slane %v1017_v6, 4  ;;  %v1034_v12 = vperm.slane %v1017_v6, %v1678_v15 }
 0x3b7   : > { %v1030_v13 = vsel %vm493_vm1, 0.0, %v1029_v11  ;;  %v1039_v14 = vrot.slane %v1034_v12, 4  ;;  %v1042_v16 = vsel %vm493_vm1, %v1034_v12, %v1041_v9 }
 0x3b8   : > { %v1038_v18 = vperm.slane %v1030_v13, %v1678_v15  ;;  %v1050_v19 = vperm.slane %v1042_v16, %v1683_v22 }
 0x3b9   : > { %v1040_v20 = vsel %vm493_vm1, %v1039_v14, %v1024_v2 }
 0x3ba   : > { %v1046_v21 = vperm.slane %v1040_v20, %v1683_v22  ;;  %v1051_v23 = vrot.slane %v1038_v18, 4  ;;  %v1054_v24 = vsel %vm493_vm1, %v1038_v18, %v1053_v17  ;;  %v1065_v25 = vrot.slane %v1050_v19, 4  ;;  %v1433_v19 = vld [vmem:[%s1917_s7] ss:$0 sm:$0xff] }
 0x3bb   : > { %v1062_v26 = vperm.slane %v1054_v24, %v1683_v22 }
 0x3bc   : > { %v1052_v27 = vsel %vm493_vm1, %v1051_v23, %v1028_v7  ;;  %v1063_v28 = vrot.slane %v1046_v21, 4  ;;  %v1066_v29 = vsel %vm493_vm1, 0.0, %v1065_v25  ;;  %v1071_v8 = vsel %vm493_vm1, %v1065_v25, %v1046_v21  ;;  %v1434_v23 = vld [vmem:[%s1918_s8] ss:$0 sm:$0xff] }
 0x3bd   : > { %v1058_v30 = vperm.slane %v1052_v27, %v1683_v22  ;;  %v1069_v31 = vrot.slane %v1062_v26, 4  ;;  %v1076_v32 = vrot.slane %v1066_v29, 4  ;;  %v1075_v40 = vperm.slane %v1071_v8, %v1678_v15 }
 0x3be   : > { %v1064_v33 = vsel %vm493_vm1, 0.0, %v1063_v28 }
 0x3bf   : > { %v1067_v34 = vrot.slane %v1058_v30, 4  ;;  %v1070_v35 = vsel %vm493_vm1, 0.0, %v1069_v31  ;;  %v1077_v36 = vsel %vm493_vm1, %v1076_v32, %v1064_v33  ;;  %v1082_v10 = vsel %vm493_vm1, %v1069_v31, %v1058_v30 }
 0x3c0   : > { %v1087_v37 = vrot.slane %v1070_v35, 4  ;;  %v1081_v38 = vperm.slane %v1077_v36, %v1678_v15  ;;  %v1086_v45 = vperm.slane %v1082_v10, %v1678_v15 }
 0x3c1   : > { %v1068_v39 = vsel %vm493_vm1, 0.0, %v1067_v34 }
 0x3c2   : > { %v1088_v41 = vsel %vm493_vm1, %v1087_v37, %v1068_v39  ;;  %v1093_v42 = vrot.slane %v1081_v38, 4 }
 0x3c3   : > { %v1092_v43 = vperm.slane %v1088_v41, %v1678_v15 }
 0x3c4   : > { %v1094_v44 = vsel %vm493_vm1, %v1093_v42, %v1075_v40 }
 0x3c5   : > { %v1098_v46 = vperm.slane %v1094_v44, %v1683_v22  ;;  %v1099_v47 = vrot.slane %v1092_v43, 4 }
 0x3c7   : > { %v1100_v48 = vsel %vm493_vm1, %v1099_v47, %v1086_v45  ;;  %v1107_v49 = vrot.slane %v1098_v46, 4 }
 0x3c8   : > { %v1104_v50 = vperm.slane %v1100_v48, %v1683_v22 }
 0x3ca   : > { %v1108_v51 = vsel %vm493_vm1, %v1104_v50, %v1107_v49  ;;  %v1105_v52 = vrot.slane %v1104_v50, 4 }
 0x3cb   : > { %1110 = vrot.lane.b32.xlu1 %v1108_v51, %s1537_s26  ;;  %s1198_s26 = sshll.u32 %s1194_s24, 4  ;;  %s1199_s26 = int_to_ptr.hbm [resolvable:$true] %s1198_s26 }
 0x3cc   : > { %v1106_v53 = vsel %vm493_vm1, %v1105_v52, %v1098_v46  ;;  %s1465_s15 = sshra.s32 %s1199_s26, 4  ;;  %s1466_s15 = int_to_ptr.hbm [resolvable:$true] %s1465_s15 }
 0x3cd   : > { %s1467_s17 = scalar_lea.hbm %s1466_s15, 8  ;;  %p1472_p1 = scmp.lt.s32.totalorder %s1466_s15, %s1919_s9 }
 0x3ce   : > { %p1468_p12 = scmp.ne.s32.totalorder %s1466_s15, %s1467_s17  ;;  %p1473_p2 = scmp.lt.s32.totalorder %s1471_s28, %s1467_s17 }
 0x3d0   : > { %p1469_p13 = pnand %p1468_p12, %p1629_p4  ;;  %p1474_p3 = por %p1473_p2, %p1472_p1 }
 0x3d2   : > { %p1470_p0 = pneg %p1469_p13 }
 0x3d4   : > { %p1475_p5 = pnand %p1474_p3, %p1470_p0 }
 0x43d   : > { %v1111_v54 = vpop.permute.xlu1 %1110 }
 0x43e   : > { %v1113_v55 = vsel %vm836_vm3, %v1106_v53, %v1111_v54 }
 0x43f   : > { %v1114_v15 = vpack.c.bf16 %v1113_v55, %v1113_v55 }
 0x441   : > { %1355 = vmatmul.msk.bf16.vlgmr.msrb.gmra.mxu3 %vm1124_vm6, %v1114_v15 }
 0x4c4   : > { %v1137_v56 = vpop.f32.mrf.mxu3 }
 0x4c5   : > { %v1138_v57 = vadd.f32 %v1137_v56, %v1670_v5 }
 0x4c7   : > { %v1142_v58 = vsel %vm438_vm0, %v1138_v57, 0.0 }
 0x4c8   : > { %1143 = vadd.xlane.f32.xlu0 %v1142_v58 }
 0x4cc   : > { %v1139_v22 = vpop.f32.mrf.mxu3 }
 0x53b   : > { %v1144_v2 = vpop.xlane.xlu0 %1143 }
 0x53c   : > { %v1152_v3 = vmul.f32 %v1151_v1, %v1144_v2 }
 0x53e   : > { %v1153_v4 = vsub.f32 %v1138_v57, %v1152_v3 }
 0x540   : > { %v1154_v6 = vmul.f32 %v1153_v4, %v1153_v4 }
 0x542   : > { %v1155_v5 = vsel %vm438_vm0, %v1154_v6, 0.0 }
 0x543   : > { %1156 = vadd.xlane.f32.xlu1 %v1155_v5 }
 0x5b6   : > { %v1157_v7 = vpop.xlane.xlu1 %1156 }
 0x5b7   : > { %v1158_v9 = vmul.f32 %v1157_v7, %v1151_v1 }
 0x5b9   : > { %v1159_v11 = vadd.f32 1e-06, %v1158_v9 }
 0x5bb   : > { %1449 = vrsqrt.f32 %v1159_v11  ;;  %vm1166_vm9 = vweird.f32 %v1159_v11 }
 0x5c1   : > { %v1450_v12 = vpop.eup %1449 }
 0x5c2   : > { %v1161_v13 = vmul.f32 %v1450_v12, %v1159_v11  ;;  %vm1167_vm8 = vweird.f32 %v1450_v12 }
 0x5c3   : > { %vm1168_vm10 = vmor %vm1166_vm9, %vm1167_vm8 }
 0x5c4   : > { %v1162_v14 = vmul.f32 %v1450_v12, %v1161_v13 }
 0x5c6   : > { %v1163_v16 = vmul.f32 0.5, %v1162_v14 }
 0x5c8   : > { %v1164_v17 = vsub.f32 1.5, %v1163_v16 }
 0x5ca   : > { %v1165_v18 = vmul.f32 %v1450_v12, %v1164_v17 }
 0x5cc   : > { %v1169_v20 = vsel %vm1168_vm10, %v1450_v12, %v1165_v18 }
 0x5cd   : > { %v1170_v21 = vmul.f32 %v1169_v20, %v1153_v4 }
 0x5cf   : > { %v1175_v24 = vmul.f32 %v1433_v19, %v1170_v21 }
 0x5d1   : > { %v1180_v25 = vadd.f32 %v1434_v23, %v1175_v24 }
 0x5d3   : > { %1181 = vst.msk [vmem:[%s394_s18] sm:$0xff] %vm438_vm0, %v1180_v25 }
 0x5d4   : > { %1478 = shalt.err (!%p1475_p5)
}
 0x5d5   : > { %1367 = dma.vmem_to_hbm [thread:$0]  (%p1629_p4), %s1197_s12, 128, %s1199_s26, %s1183_s29  }
 0x5d6 PF: > { %p1373_p6 = scmp.ge.s32.totalorder %s1529_s14, 2  ;;  %s1210_s27 = sand.u32 1, %s1509_s30  }
 0x5d7   : > { %s1211_s16 = scalar_lea.sflag [#allocation9], %s1210_s27 }
 0x5d8   : > { %p1370_p7 = pnand %p1373_p6, %p1636_p8 }
 0x5da   : > { %p1371_p9 = pneg %p1370_p7 }
 0x5dc   : > { %1504 = dma.done.wait (%p1371_p9), %s1211_s16, 128  }
 0x5dd   : > { %1506 = vsyncadd (%p1371_p9), %s1211_s16, 4294967168  ;;  %s22_s14 = sadd.s32 1, %s1529_s14   ;;  %s1924_s19 = sld [smem:[#allocation11_spill]] }
 0x5de   : > { %p19_p10 = scmp.ge.s32.totalorder %s22_s14, 4   ;;  %s1925_s30 = smov %s1513_s10 }
 0x5df   : > { %s1926_s10 = smov %s1517_s11  ;;  %s1927_s11 = smov %s1642_s22 }
 0x5e0   : > { %s1928_s12 = smov %s1525_s13  ;;  %21 = sbr.rel (!%p19_p10) target bundleno = 4 (0x4), region = 113 }
 0x5e3   : > { %s1929_s13 = smov %s1924_s19 }
 0x5e5   :  { %1217 = vsyncpa [#allocation9], 1 }
 0x5e6   :  { %1219 = vsyncpa [#allocation9 + $0x1], 1 }

</bundles_post_ra>
